<compile_context>
chip_gen: v6e
topology: v6e:2x2x1
jax: 0.10.0
libtpu: 0.0.40
codegen_flags: <defaults>
</compile_context>

<pallas_src>
import functools

import jax
import jax.numpy as jnp
from jax.experimental import pallas as pl
from jax.experimental.pallas import tpu as pltpu


# --------------------------- sizing helpers ----------------------------------
def _vmem_budget_bytes():
    """Generation-aware VMEM budget (~75% of physical, capped at 100 MiB)."""
    try:
        total = int(pltpu.get_tpu_info().vmem_capacity_bytes)
    except Exception:
        total = 64 * 1024 * 1024          # conservative: v7x has 64 MiB / TC
    return min((total * 3) // 4, 100 * 1024 * 1024)


def _sublane_unit(dtype):
    """Sublane packing unit: 8 (32-bit), 16 (16-bit), 32 (8-bit) elements."""
    return {4: 8, 2: 16, 1: 32}.get(jnp.dtype(dtype).itemsize, 8)


def _pick_tile(total, unit, cap):
    """Largest multiple of `unit` that divides `total` and is <= cap.

    Falls back to the full extent (always a legal BlockSpec block) when no
    such divisor exists (e.g. C=4 with unit=8, or HW=49 with unit=128).
    """
    best = None
    t = unit
    limit = min(total, max(cap, unit))
    while t <= limit:
        if total % t == 0:
            best = t
        t += unit
    return best if best is not None else total


def _pick_tiles(C, HW, itemsize, c_unit, max_block_bytes):
    """(c_tile, hw_tile): lane-dense HW tiles (multiple of 128), sublane/
    packing-aligned C tiles, block bytes <= max_block_bytes when divisors
    allow it."""
    hw_cap = max(128, max_block_bytes // (itemsize * c_unit))
    hw_tile = _pick_tile(HW, 128, hw_cap)
    c_cap = max(c_unit, max_block_bytes // (itemsize * hw_tile))
    c_tile = _pick_tile(C, c_unit, c_cap)
    return c_tile, hw_tile


# ------------------- fused single-pass kernel (2x|x| traffic) -----------------
def _fused_eca_kernel(w_ref, b_ref, x_ref, o_ref, pad_ref, *, C, K, inv_hw):
    # w_ref: SMEM (K,) f32 conv taps; b_ref: SMEM (1,) f32 bias
    # x_ref/o_ref: VMEM (1, C, HW); pad_ref: VMEM (C + K - 1, 1) f32 scratch
    p = (K - 1) // 2
    # Per-channel mean, accumulated in f32 regardless of input dtype.
    mean = jnp.sum(x_ref[...], axis=2, keepdims=True,
                   dtype=jnp.float32) * inv_hw                 # (1, C, 1)
    # Zero-padded channel means -> K-tap conv via K shifted static slices.
    pad_ref[...] = jnp.zeros_like(pad_ref)
    pad_ref[pl.ds(p, C), :] = mean[0]                          # rows p..p+C-1
    conv = w_ref[0] * pad_ref[pl.ds(0, C), :]
    for j in range(1, K):
        conv = conv + w_ref[j] * pad_ref[pl.ds(j, C), :]
    conv = conv + b_ref[0]                                     # (C, 1) f32
    gate = jax.nn.sigmoid(conv)[None].astype(o_ref.dtype)      # (1, C, 1)
    # Big multiply in the input dtype (only the tiny gate vector is cast).
    o_ref[...] = x_ref[...] * gate


# --------------------- fallback pass 1: GAP partial sums ----------------------
def _gap_sum_kernel(x_ref, sum_ref):
    # x_ref:   VMEM (1, c_tile, hw_tile)
    # sum_ref: VMEM (1, 1, c_tile, 1) f32 accumulator, resident across HW tiles
    @pl.when(pl.program_id(3) == 0)
    def _():
        sum_ref[...] = jnp.zeros_like(sum_ref)

    sum_ref[...] += jnp.sum(x_ref[...], axis=2, keepdims=True,
                            dtype=jnp.float32)[None]


# --------------------- fallback pass 2: channel-wise rescale ------------------
def _rescale_kernel(att_ref, x_ref, o_ref):
    # att_ref: VMEM (1, c_tile, 1) f32 gate; x_ref/o_ref: (1, c_tile, hw_tile)
    o_ref[...] = x_ref[...] * att_ref[...].astype(x_ref.dtype)


# ------------------------------ public wrapper --------------------------------
def eca_attention(x, weight, bias, *, _force_two_pass=False):
    """ECA forward. x: (B, C, H, W); weight: (k,) Conv1d taps; bias: (1,)."""
    B, C, H, W = x.shape
    HW = H * W
    x3 = x.reshape(B, C, HW)
    itemsize = jnp.dtype(x.dtype).itemsize

    w = jnp.asarray(weight, jnp.float32).reshape(-1)
    b = jnp.asarray(bias, jnp.float32).reshape(1)
    K = int(w.shape[0])

    vmem_budget = _vmem_budget_bytes()
    slab_bytes = C * HW * itemsize

    # ------------- fused single-pass path (preferred, 2x|x| HBM traffic) -----
    # Needs 2 input buffers + 2 output buffers of one (1, C, HW) slab in VMEM.
    # NOTE: for B == 1 on v7x this runs on a single TensorCore; the two-pass
    # path below keeps megacore busy for that corner at the cost of 3x traffic.
    if (not _force_two_pass) and (4 * slab_bytes + (1 << 20) <= vmem_budget):
        kernel = functools.partial(_fused_eca_kernel, C=C, K=K, inv_hw=1.0 / HW)
        out3 = pl.pallas_call(
            kernel,
            out_shape=jax.ShapeDtypeStruct((B, C, HW), x.dtype),
            grid=(B,),
            in_specs=[
                pl.BlockSpec(memory_space=pltpu.MemorySpace.SMEM),   # weight
                pl.BlockSpec(memory_space=pltpu.MemorySpace.SMEM),   # bias
                pl.BlockSpec((1, C, HW), lambda bi: (bi, 0, 0)),
            ],
            out_specs=pl.BlockSpec((1, C, HW), lambda bi: (bi, 0, 0)),
            scratch_shapes=[pltpu.VMEM((C + K - 1, 1), jnp.float32)],
            compiler_params=pltpu.CompilerParams(
                dimension_semantics=("parallel",),
                vmem_limit_bytes=vmem_budget),
            cost_estimate=pl.CostEstimate(
                flops=2 * B * C * HW,
                transcendentals=B * C,
                bytes_accessed=2 * B * C * HW * itemsize + (K + 1) * 4),
        )(w, b, x3)
        return out3.reshape(B, C, H, W)

    # ------------- fallback: two streaming passes (large per-batch slabs) ----
    c_unit = _sublane_unit(x.dtype)

    # Pass 1: only the input is double-buffered (accumulator is tiny/resident),
    # so its block can take ~1/4 of the VMEM budget.
    c1, hw1 = _pick_tiles(C, HW, itemsize, c_unit, vmem_budget // 4)
    n_c1, n_hw1 = C // c1, HW // hw1
    # v7x megacore: guarantee a parallel axis of extent >= 2 by splitting the
    # HW reduction into two partial sums when B and the C tiling cannot.
    split = 2 if (B * n_c1 < 2 and n_hw1 >= 2 and n_hw1 % 2 == 0) else 1
    n_hw1s = n_hw1 // split

    partial_sums = pl.pallas_call(
        _gap_sum_kernel,
        out_shape=jax.ShapeDtypeStruct((split, B, C, 1), jnp.float32),
        grid=(split, B, n_c1, n_hw1s),
        in_specs=[pl.BlockSpec(
            (1, c1, hw1),
            lambda s, bi, ci, hi: (bi, ci, s * n_hw1s + hi))],
        out_specs=pl.BlockSpec(
            (1, 1, c1, 1), lambda s, bi, ci, hi: (s, bi, ci, 0)),
        compiler_params=pltpu.CompilerParams(
            dimension_semantics=("parallel", "parallel", "parallel",
                                 "arbitrary"),
            vmem_limit_bytes=vmem_budget),
        cost_estimate=pl.CostEstimate(
            flops=B * C * HW, transcendentals=0,
            bytes_accessed=B * C * HW * itemsize + split * B * C * 4),
    )(x3)

    # Gate: k-tap conv over channels + sigmoid (O(B*C), tiny, plain JAX).
    p = (K - 1) // 2
    mean = partial_sums.sum(axis=0)[:, :, 0] / HW            # divide by true HW
    gp = jnp.pad(mean, ((0, 0), (p, p)))                     # zero pad channels
    conv = b[0]
    for j in range(K):
        conv = conv + w[j] * gp[:, j:j + C]
    att = jax.nn.sigmoid(conv)[:, :, None]                   # (B, C, 1) f32

    # Pass 2: 2 input + 2 output buffers of the x tile -> ~1/5 of the budget.
    c2, hw2 = _pick_tiles(C, HW, itemsize, c_unit, vmem_budget // 5)
    n_c2, n_hw2 = C // c2, HW // hw2
    # TODO(synk): if xprof still shows exposed DMA here, add
    # pipeline_mode=pl.Buffered(3) to the x3 BlockSpec below.
    out3 = pl.pallas_call(
        _rescale_kernel,
        out_shape=jax.ShapeDtypeStruct((B, C, HW), x.dtype),
        grid=(B, n_c2, n_hw2),
        in_specs=[
            pl.BlockSpec((1, c2, 1), lambda bi, ci, hi: (bi, ci, 0)),
            pl.BlockSpec((1, c2, hw2), lambda bi, ci, hi: (bi, ci, hi)),
        ],
        out_specs=pl.BlockSpec((1, c2, hw2), lambda bi, ci, hi: (bi, ci, hi)),
        compiler_params=pltpu.CompilerParams(
            dimension_semantics=("parallel", "parallel", "parallel"),
            vmem_limit_bytes=vmem_budget),
        cost_estimate=pl.CostEstimate(
            flops=B * C * HW, transcendentals=0,
            bytes_accessed=2 * B * C * HW * itemsize + B * C * 4),
    )(att, x3)
    return out3.reshape(B, C, H, W)


# ------------------------------ plain-JAX reference ---------------------------
def _reference(x, weight, bias):
    B, C, H, W = x.shape
    k = weight.shape[0]
    p = (k - 1) // 2
    gap = jnp.mean(x, axis=(2, 3))                           # (B, C)
    gp = jnp.pad(gap, ((0, 0), (p, p)))
    conv = sum(weight[j] * gp[:, j:j + C] for j in range(k)) + bias[0]
    att = jax.nn.sigmoid(conv)
    return x * att[:, :, None, None]


if __name__ == "__main__":
    key = jax.random.PRNGKey(0)
    kx, kw, kb = jax.random.split(key, 3)

    B, C, H, W = 2, 4, 16, 16
    x = jax.random.normal(kx, (B, C, H, W), dtype=jnp.float32)

    # Conv1d(1, 1, kernel_size=3) parameters, deterministic synthetic init.
    weight = jax.random.normal(kw, (3,), dtype=jnp.float32) * 0.5
    bias = jax.random.normal(kb, (1,), dtype=jnp.float32) * 0.1

    ref = _reference(x, weight, bias)

    # Primary (fused single-pass) path.
    out = jax.block_until_ready(eca_attention(x, weight, bias))
    assert out.shape == x.shape
    assert jnp.allclose(out, ref, atol=1e-5, rtol=1e-5), "fused path mismatch"

    # Fallback (two-pass streaming) path, exercised explicitly.
    out2 = jax.block_until_ready(
        eca_attention(x, weight, bias, _force_two_pass=True))
    assert jnp.allclose(out2, ref, atol=1e-5, rtol=1e-5), "two-pass mismatch"

    print("KERNEL_OK")
</pallas_src>

<mosaic_0001>
module attributes {stable_mosaic.version = 11 : i64} {
  func.func @_fused_eca_kernel(%arg0: i32, %arg1: memref<3xf32, #tpu.memory_space<smem>>, %arg2: memref<1xf32, #tpu.memory_space<smem>>, %arg3: memref<1x4x256xf32, #tpu.memory_space<vmem>>, %arg4: memref<1x4x256xf32, #tpu.memory_space<vmem>>, %arg5: memref<6x1xf32, #tpu.memory_space<vmem>>) attributes {dimension_semantics = [#tpu.dimension_semantics<parallel>], iteration_bounds = array<i64: 2>, scalar_prefetch = 0 : i64, scratch_operands = 1 : i64, tpu.core_type = #tpu.core_type<tc>, window_params = [{transform_indices = @transform_0, window_bounds = array<i64: 3>}, {transform_indices = @transform_1, window_bounds = array<i64: 1>}, {transform_indices = @transform_2, window_bounds = array<i64: 1, 4, 256>}, {transform_indices = @transform_3, window_bounds = array<i64: 1, 4, 256>}]} {
    %c0 = arith.constant 0 : index
    %c0_0 = arith.constant 0 : index
    %c0_1 = arith.constant 0 : index
    %0 = vector.load %arg3[%c0, %c0_0, %c0_1] : memref<1x4x256xf32, #tpu.memory_space<vmem>>, vector<1x4x256xf32>
    %cst = arith.constant dense<0.000000e+00> : vector<1x4xf32>
    %1 = vector.multi_reduction <add>, %0, %cst [2] : vector<1x4x256xf32> to vector<1x4xf32>
    %2 = vector.shape_cast %1 : vector<1x4xf32> to vector<1x4x1xf32>
    %cst_2 = arith.constant 3.906250e-03 : f32
    %3 = vector.broadcast %cst_2 : f32 to vector<1x4x1xf32>
    %4 = arith.mulf %2, %3 : vector<1x4x1xf32>
    %cst_3 = arith.constant 0.000000e+00 : f32
    %5 = vector.broadcast %cst_3 : f32 to vector<6x1xf32>
    %c0_4 = arith.constant 0 : index
    %c0_5 = arith.constant 0 : index
    %6 = vector.load %arg5[%c0_4, %c0_5] : memref<6x1xf32, #tpu.memory_space<vmem>>, vector<6x1xf32>
    tpu.vector_store %arg5[%c0_4, %c0_5], %5 {strides = array<i32>} : memref<6x1xf32, #tpu.memory_space<vmem>>, vector<6x1xf32>,
    %7 = vector.shape_cast %4 : vector<1x4x1xf32> to vector<4x1xf32>
    %c1 = arith.constant 1 : index
    %c0_6 = arith.constant 0 : index
    %8 = vector.load %arg5[%c1, %c0_6] : memref<6x1xf32, #tpu.memory_space<vmem>>, vector<4x1xf32>
    tpu.vector_store %arg5[%c1, %c0_6], %7 {strides = array<i32>} : memref<6x1xf32, #tpu.memory_space<vmem>>, vector<4x1xf32>,
    %c0_7 = arith.constant 0 : index
    %9 = memref.load %arg1[%c0_7] : memref<3xf32, #tpu.memory_space<smem>>
    %c0_8 = arith.constant 0 : index
    %c0_9 = arith.constant 0 : index
    %10 = vector.load %arg5[%c0_8, %c0_9] : memref<6x1xf32, #tpu.memory_space<vmem>>, vector<4x1xf32>
    %11 = vector.broadcast %9 : f32 to vector<4x1xf32>
    %12 = arith.mulf %11, %10 : vector<4x1xf32>
    %c1_10 = arith.constant 1 : index
    %13 = memref.load %arg1[%c1_10] : memref<3xf32, #tpu.memory_space<smem>>
    %c1_11 = arith.constant 1 : index
    %c0_12 = arith.constant 0 : index
    %14 = vector.load %arg5[%c1_11, %c0_12] : memref<6x1xf32, #tpu.memory_space<vmem>>, vector<4x1xf32>
    %15 = vector.broadcast %13 : f32 to vector<4x1xf32>
    %16 = arith.mulf %15, %14 : vector<4x1xf32>
    %17 = arith.addf %12, %16 : vector<4x1xf32>
    %c2 = arith.constant 2 : index
    %18 = memref.load %arg1[%c2] : memref<3xf32, #tpu.memory_space<smem>>
    %c2_13 = arith.constant 2 : index
    %c0_14 = arith.constant 0 : index
    %19 = vector.load %arg5[%c2_13, %c0_14] : memref<6x1xf32, #tpu.memory_space<vmem>>, vector<4x1xf32>
    %20 = vector.broadcast %18 : f32 to vector<4x1xf32>
    %21 = arith.mulf %20, %19 : vector<4x1xf32>
    %22 = arith.addf %17, %21 : vector<4x1xf32>
    %c0_15 = arith.constant 0 : index
    %23 = memref.load %arg2[%c0_15] : memref<1xf32, #tpu.memory_space<smem>>
    %24 = vector.broadcast %23 : f32 to vector<4x1xf32>
    %25 = arith.addf %22, %24 : vector<4x1xf32>
    %26 = arith.negf %25 : vector<4x1xf32>
    %27 = math.exp %26 : vector<4x1xf32>
    %cst_16 = arith.constant 1.000000e+00 : f32
    %28 = vector.broadcast %cst_16 : f32 to vector<4x1xf32>
    %29 = arith.addf %28, %27 : vector<4x1xf32>
    %30 = arith.divf %28, %29 : vector<4x1xf32>
    %31 = vector.shape_cast %30 : vector<4x1xf32> to vector<1x4x1xf32>
    %c0_17 = arith.constant 0 : index
    %c0_18 = arith.constant 0 : index
    %c0_19 = arith.constant 0 : index
    %32 = vector.load %arg3[%c0_17, %c0_18, %c0_19] : memref<1x4x256xf32, #tpu.memory_space<vmem>>, vector<1x4x256xf32>
    %33 = vector.broadcast %31 : vector<1x4x1xf32> to vector<1x4x256xf32>
    %34 = arith.mulf %32, %33 : vector<1x4x256xf32>
    %c0_20 = arith.constant 0 : index
    %c0_21 = arith.constant 0 : index
    %c0_22 = arith.constant 0 : index
    %35 = vector.load %arg4[%c0_20, %c0_21, %c0_22] : memref<1x4x256xf32, #tpu.memory_space<vmem>>, vector<1x4x256xf32>
    tpu.vector_store %arg4[%c0_20, %c0_21, %c0_22], %34 {strides = array<i32>} : memref<1x4x256xf32, #tpu.memory_space<vmem>>, vector<1x4x256xf32>,
    return
  }
  func.func @transform_0(%arg0: i32) -> i32 {
    %c0_i32 = arith.constant 0 : i32
    %c0_i32_0 = arith.constant 0 : i32
    return %c0_i32 : i32
  }
  func.func @transform_1(%arg0: i32) -> i32 {
    %c0_i32 = arith.constant 0 : i32
    %c0_i32_0 = arith.constant 0 : i32
    return %c0_i32 : i32
  }
  func.func @transform_2(%arg0: i32) -> (i32, i32, i32) {
    %c0_i32 = arith.constant 0 : i32
    %c0_i32_0 = arith.constant 0 : i32
    %c0_i32_1 = arith.constant 0 : i32
    return %arg0, %c0_i32, %c0_i32_0 : i32, i32, i32
  }
  func.func @transform_3(%arg0: i32) -> (i32, i32, i32) {
    %c0_i32 = arith.constant 0 : i32
    %c0_i32_0 = arith.constant 0 : i32
    %c0_i32_1 = arith.constant 0 : i32
    return %arg0, %c0_i32, %c0_i32_0 : i32, i32, i32
  }
}

</mosaic_0001>

<bundles_post_ra>
// kernel: tpu_custom_call.1
= control target key start
LH: loop header
LB: loop body
LE: loop exit
PB: predicated region body
PF: predicated region fallthrough
CT: control target
= control target key end

     0   :  { %s751_s0 = inlined_call_operand.vmem [shape: f32[3], index: 0, kind: input, shape index: {}]   ;;  %s752_s1 = inlined_call_operand.<no memory space> [shape: f32[1], index: 1, kind: input, shape index: {}]   ;;  %s753_s2 = inlined_call_operand.hbm [shape: f32[2,4,256], index: 2, kind: input, shape index: {}]   ;;  %s754_s3 = inlined_call_operand.hbm [shape: f32[2,4,256], index: 3, kind: output, shape index: {}]  }
   0x1   :  { %8 = sst [smem:[#allocation3]] %s752_s1 }
   0x2   :  { %9 = vsyncpa [#allocation7], 0 }
   0x3   :  { %10 = vsyncpa [#allocation5], 0 }
   0x4   :  { %12 = vsyncpa [#allocation5 + $0x1], 0 }
   0x5   :  { %13 = vsyncpa [#allocation6], 0 }
   0x6   :  { %15 = vsyncpa [#allocation6 + $0x1], 0  ;;  %s581_s14 = smov 0   ;;  %s583_s15 = smov 0  }
   0x7   :  { %s585_s16 = smov 0   ;;  %s587_s17 = smov 0  }
   0x8 LB: > { %s602_s1 = sadd.s32 4294967295, %s550_s17   ;;  %s352_s18 = sadd.s32 4294967294, %s550_s17   ;;  %s550_s17 = sphi %s587_s17, %s777_s17   ;;  %s546_s16 = sphi %s585_s16, %s776_s16   ;;  %s542_s15 = sphi %s583_s15, %s775_s15   ;;  %s538_s14 = sphi %s581_s14, %s774_s14  }
   0x9   : > { %p83_p0 = scmp.ne.s32.totalorder %s542_s15, %s538_s14  ;;  %p755_p1 = scmp.eq.s32.totalorder %s602_s1, 0 }
   0xa   : > { %p113_p3 = scmp.eq.s32.totalorder %s352_s18, 1  ;;  %p353_p5 = scmp.ge.s32.totalorder %s550_s17, 1 }
   0xb   : > { %p611_p4 = por %p755_p1, %p83_p0  ;;  %p120_p7 = scmp.lt.s32.totalorder %s550_s17, 3 }
   0xc   : > { %p616_p6 = por %p113_p3, %p83_p0  ;;  %s133_s23 = sshll.u32 %s751_s0, 4  ;;  %s134_s23 = int_to_ptr.vmem [resolvable:$true] %s133_s23 }
   0xd   : > { %s759_s19 = scalar_select %p611_p4, 1, 0 }
   0xe   : > { %s760_s20 = scalar_select %p616_p6, 1, 0 }
   0xf   : > { %p624_p8 = pnand %p353_p5, %p120_p7  ;;  %s632_s25 = sadd.s32 1, %s550_s17  }
  0x10   : > { %s67_s27 = ssub.s32 %s550_s17, %s632_s25  ;;  %s70_s29 = sadd.s32 1, %s546_s16 }
  0x11   : > { %s761_s24 = scalar_select %p624_p8, 1, 0 }
  0x12   : > { %p381_p10 = pneg %p624_p8  ;;  %p642_p12 = scmp.eq.s32.totalorder %s67_s27, 0 }
  0x13   : > { %p77_p13 = scmp.ne.s32.totalorder %s546_s16, %s542_s15  ;;  %s439_s30 = scalar_lea.vmem %s134_s23, 16 }
  0x14   : > { %p636_p11 = pnand %p381_p10, %p755_p1  ;;  %p440_p0 = scmp.ne.s32.totalorder %s134_s23, %s439_s30 }
  0x15   : > { %p447_p9 = scmp.lt.s32.totalorder %s134_s23, %s134_s23  ;;  %p448_p2 = scmp.lt.s32.totalorder %s439_s30, %s439_s30 }
  0x16   : > { %p441_p3 = pneg %p636_p11 }
  0x17   : > { %p449_p10 = por %p448_p2, %p447_p9 }
  0x18   : > { %p442_p5 = pnand %p441_p3, %p440_p0 }
  0x1a   : > { %p443_p7 = pneg %p442_p5 }
  0x1c   : > { %p450_p1 = pnand %p449_p10, %p443_p7 }
  0x1e   : > { %453 = shalt.err (!%p450_p1)
}
  0x1f   : > { %s552_s4 = smov [#allocation4]   ;;  %p78_p2 = scmp.eq.s32.totalorder %s550_s17, 0 }
  0x20   : > { %384 = dma.vmem_to_smem (!%p636_p11), %s134_s23, 16, %s552_s4, [#allocation7]  }
  0x21   : > { %s656_s5 = scalar_select %p642_p12, %s546_s16, %s70_s29  }
  0x22   : > { %p764_p1 = scmp.eq.s32.totalorder %s602_s1, 1  ;;  %p394_p0 = scmp.lt.s32.totalorder %s550_s17, 2 }
  0x23   : > { %s147_s7 = sand.u32 1, %s546_s16   ;;  %p79_p3 = por %p78_p2, %p77_p13 }
  0x24   : > { %p664_p9 = por %p764_p1, %p77_p13  ;;  %s356_s8 = sshll.u32 %s147_s7, 3 }
  0x25   : > { %s371_s9 = sshll.u32 %s550_s17, 7  ;;  %s151_s13 = scalar_lea.vmem [#allocation8], %s356_s8 }
  0x26   : > { %s765_s6 = scalar_select %p664_p9, 1, 0 }
  0x27   : > { %s677_s12 = scalar_lea.hbm %s753_s2, %s371_s9  ;;  %s159_s18 = sshll.u32 %s151_s13, 4  ;;  %s160_s18 = int_to_ptr.vmem [resolvable:$true] %s159_s18 }
  0x28   : > { %p679_p11 = pnand %p394_p0, %p79_p3  ;;  %s148_s22 = scalar_lea.sflag [#allocation5], %s147_s7 }
  0x29   : > { %s454_s23 = scalar_lea.hbm %s677_s12, 128  ;;  %s459_s28 = scalar_lea.hbm %s753_s2, 256 }
  0x2a   : > { %p455_p12 = scmp.ne.s32.totalorder %s677_s12, %s454_s23  ;;  %p456_p13 = pneg %p679_p11 }
  0x2b   : > { %p460_p10 = scmp.lt.s32.totalorder %s677_s12, %s753_s2  ;;  %p461_p2 = scmp.lt.s32.totalorder %s459_s28, %s454_s23 }
  0x2c   : > { %p457_p5 = pnand %p456_p13, %p455_p12 }
  0x2d   : > { %p462_p1 = por %p461_p2, %p460_p10 }
  0x2e   : > { %p458_p7 = pneg %p457_p5 }
  0x30   : > { %p463_p0 = pnand %p462_p1, %p458_p7 }
  0x32   : > { %466 = shalt.err (!%p463_p0)
}
  0x33   : > { %s467_s4 = scalar_lea.vmem %s160_s18, 128  ;;  %s553_s7 = smov [#allocation8]  }
  0x34   : > { %p468_p3 = scmp.ne.s32.totalorder %s160_s18, %s467_s4  ;;  %s472_s8 = sshll.u32 %s553_s7, 4  ;;  %s473_s8 = int_to_ptr.vmem [resolvable:$false] %s472_s8 }
  0x35   : > { %s474_s9 = scalar_lea.vmem %s473_s8, 256  ;;  %p475_p12 = scmp.lt.s32.totalorder %s160_s18, %s473_s8 }
  0x36   : > { %p470_p6 = pnand %p468_p3, %p456_p13  ;;  %p476_p5 = scmp.lt.s32.totalorder %s474_s9, %s467_s4 }
  0x38   : > { %p471_p9 = pneg %p470_p6  ;;  %p477_p4 = por %p476_p5, %p475_p12 }
  0x3a   : > { %p478_p8 = pnand %p477_p4, %p471_p9 }
  0x3c   : > { %481 = shalt.err (!%p478_p8)
}
  0x3d   : > { %388 = dma.hbm_to_vmem [thread:$0]  (!%p679_p11), %s677_s12, 128, %s160_s18, %s148_s22  }
  0x3e   : > { %p767_p7 = scmp.ne.s32.totalorder %s761_s24, 0 }
  0x3f   : > { %p768_p10 = scmp.eq.s32.totalorder (!%p767_p7), %s602_s1, 0 }
  0x40   : > { %168 = sbr.rel (%p767_p7) target bundleno = 412 (0x19c), region = 32 }
  0x45   : > { %525 = dma.done.wait (%p768_p10), [#allocation7], 16   ;;  %p769_p6 = pmov %p768_p10 }
  0x46   : > { %s704_s10 = sand.u32 1, %s542_s15   ;;  %p770_p4 = scmp.ne.s32.totalorder %s759_s19, 0 }
  0x47   : > { %527 = vsyncadd (%p769_p6), [#allocation7], 4294967280  ;;  %s361_s11 = sshll.u32 %s704_s10, 3  ;;  %s175_s13 = scalar_lea.sflag [#allocation5], %s704_s10 }
  0x48   : > { %s178_s12 = scalar_lea.vmem [#allocation8], %s361_s11 }
  0x49   : > { %529 = dma.done.wait (%p770_p4), %s175_s13, 128  }
  0x4a   : > { %531 = vsyncadd (%p770_p4), %s175_s13, 4294967168 }
  0x4b   : > { %183 = sfence }
  0x4c   : > { %v202_v0 = vld [vmem:[%s178_s12] sm:$0xff]  ;;  %vm206_vm0 = vcmask 1043456   ;;  %vm213_vm1 = vcmask 5120   ;;  %v554_v3 = vmov 0.0   ;;  %v555_v6 = vmov 0   ;;  %s217_s24 = sld [smem:[#allocation4]] }
  0x4d   : > { %v204_v1 = vcombine.high %v202_v0, %v202_v0  ;;  %v207_v2 = vsel %vm206_vm0, %v202_v0, 0.0  ;;  %214 = vst.msk [vmem:[#allocation2] sm:$0x3f] %vm213_vm1, %v554_v3  ;;  %433 = vset.pattern.permute.xlu0 %v555_v6  ;;  %vm215_vm2 = vcmask 3072   ;;  %s363_s18 = sld [smem:[#allocation4 + $0x1]]  ;;  %v248_v28 = vlaneseq  ;;  %s372_s22 = sshll.u32 %s602_s1, 7 }
  0x4e   : > { %s364_s19 = sld [smem:[#allocation4 + $0x2]]  ;;  %v556_v26 = vmov 839922192   ;;  %s201_s23 = scalar_lea.vmem [#allocation9], %s361_s11 }
  0x4f   : > { %v208_v4 = vsel %vm206_vm0, %v204_v1, 0.0  ;;  %s231_s21 = sld [smem:[#allocation3]]  ;;  %v246_v27 = vunpack.c.l.s4 %v556_v26  ;;  %v249_v30 = vshrl.u32 %v248_v28, 7  ;;  %s270_s26 = sshll.u32 %s201_s23, 4  ;;  %s271_s26 = int_to_ptr.vmem [resolvable:$true] %s270_s26 }
  0x50   : > { %v209_v5 = vadd.f32 %v208_v4, %v207_v2  ;;  %s268_s29 = scalar_lea.hbm %s754_s3, %s372_s22  ;;  %s256_s30 = scalar_lea.sflag [#allocation6], %s704_s10 }
  0x51   : > { %v247_v29 = vunpack.c.0.s8 %v246_v27  ;;  %s482_s4 = scalar_lea.vmem %s271_s26, 128  ;;  %p771_p9 = scmp.ne.s32.totalorder %s765_s6, 0 }
  0x52   : > { %210 = vadd.xlane.f32.xlu0 %v209_v5  ;;  %v219_v9 = vstv %s217_s24  ;;  %p483_p8 = scmp.ne.s32.totalorder %s271_s26, %s482_s4  ;;  %s557_s7 = smov [#allocation9]  }
  0x53   : > { %v223_v10 = vstv %s363_s18  ;;  %v250_v31 = vsub.s32 %v247_v29, %v249_v30  ;;  %s486_s8 = sshll.u32 %s557_s7, 4  ;;  %s487_s8 = int_to_ptr.vmem [resolvable:$false] %s486_s8 }
  0x54   : > { %v228_v11 = vstv %s364_s19  ;;  %p484_p11 = pnand %p483_p8, %p771_p9  ;;  %s488_s1 = scalar_lea.vmem %s487_s8, 256 }
  0x55   : > { %v232_v19 = vstv %s231_s21  ;;  %p489_p2 = scmp.lt.s32.totalorder %s271_s26, %s487_s8  ;;  %p490_p1 = scmp.lt.s32.totalorder %s488_s1, %s482_s4 }
  0x56   : > { %p485_p13 = pneg %p484_p11 }
  0x57   : > { %p491_p0 = por %p490_p1, %p489_p2 }
  0x59   : > { %p492_p3 = pnand %p491_p0, %p485_p13 }
  0xdb   : > { %v211_v7 = vpop.xlane.xlu0 %210 }
  0xdc   : > { %v212_v8 = vmul.f32 0.00390625, %v211_v7 }
  0xde   : > { %216 = vst.msk [vmem:[#allocation2 + $0x1] sm:$0xf] %vm215_vm2, %v212_v8 }
  0xe5   : > { %v218_v12 = vld [vmem:[#allocation2] sm:$0xf] }
  0xe6   : > { %v222_v13 = vld [vmem:[#allocation2 + $0x1] sm:$0xf]  ;;  %v220_v15 = vmul.f32 %v219_v9, %v218_v12 }
  0xe7   : > { %v227_v14 = vld [vmem:[#allocation2 + $0x2] sm:$0xf]  ;;  %v224_v16 = vmul.f32 %v223_v10, %v222_v13 }
  0xe8   : > { %v229_v17 = vmul.f32 %v228_v11, %v227_v14 }
  0xe9   : > { %v225_v18 = vadd.f32 %v224_v16, %v220_v15 }
  0xeb   : > { %v230_v20 = vadd.f32 %v229_v17, %v225_v18 }
  0xed   : > { %v233_v21 = vadd.f32 %v232_v19, %v230_v20 }
  0xef   : > { %v365_v22 = vmul.f32 -1.442695, %v233_v21 }
  0xf1   : > { %435 = vpow2.f32 %v365_v22 }
  0xfe   : > { %v436_v23 = vpop.eup %435 }
  0xff   : > { %v237_v24 = vadd.f32 1.0, %v436_v23 }
 0x101   : > { %437 = vrcp.f32 %v237_v24 }
 0x10e   : > { %v438_v25 = vpop.eup %437 }
 0x10f   : > { %243 = vperm.xlu0 %433, %v438_v25  }
 0x18a   : > { %v244_v32 = vpop.permute.xlu0 %243 }
 0x18b   : > { %v251_v33 = vrot.slane %v244_v32, %v250_v31 }
 0x18d   : > { %v253_v34 = vmul.f32 %v251_v33, %v202_v0 }
 0x18f   : > { %254 = vst [vmem:[%s201_s23] sm:$0xff] %v253_v34 }
 0x190   : > { %495 = shalt.err (!%p492_p3)
}
 0x191   : > { %s496_s9 = scalar_lea.hbm %s268_s29, 128  ;;  %s500_s13 = scalar_lea.hbm %s754_s3, 256 }
 0x192   : > { %p497_p12 = scmp.ne.s32.totalorder %s268_s29, %s496_s9  ;;  %p501_p10 = scmp.lt.s32.totalorder %s268_s29, %s754_s3 }
 0x193   : > { %p502_p6 = scmp.lt.s32.totalorder %s500_s13, %s496_s9 }
 0x194   : > { %p498_p5 = pnand %p497_p12, %p771_p9 }
 0x195   : > { %p503_p4 = por %p502_p6, %p501_p10 }
 0x196   : > { %p499_p7 = pneg %p498_p5 }
 0x198   : > { %p504_p8 = pnand %p503_p4, %p499_p7 }
 0x19a   : > { %507 = shalt.err (!%p504_p8)
}
 0x19b   : > { %379 = dma.vmem_to_hbm [thread:$0]  (%p771_p9), %s271_s26, 128, %s268_s29, %s256_s30  }
 0x19c PF: > { %s282_s18 = sand.u32 1, %s538_s14   ;;  %p772_p11 = scmp.ne.s32.totalorder %s760_s20, 0 }
 0x19d   : > { %p773_p13 = scmp.ge.s32.totalorder %s550_s17, 2  ;;  %s283_s19 = scalar_lea.sflag [#allocation6], %s282_s18 }
 0x19f   : > { %p390_p2 = pnand %p773_p13, %p772_p11 }
 0x1a1   : > { %p391_p1 = pneg %p390_p2 }
 0x1a3   : > { %533 = dma.done.wait (%p391_p1), %s283_s19, 128  }
 0x1a4   : > { %535 = vsyncadd (%p391_p1), %s283_s19, 4294967168  ;;  %p18_p0 = scmp.ge.s32.totalorder %s632_s25, 4   ;;  %s774_s14 = smov %s542_s15 }
 0x1a5   : > { %s775_s15 = smov %s546_s16  ;;  %s776_s16 = smov %s656_s5 }
 0x1a6   : > { %s777_s17 = smov %s632_s25  ;;  %20 = sbr.rel (!%p18_p0) target bundleno = 8 (0x8), region = 82 }
 0x1ab   :  { %288 = vsyncpa [#allocation5], 1 }
 0x1ac   :  { %290 = vsyncpa [#allocation5 + $0x1], 1 }
 0x1ad   :  { %291 = vsyncpa [#allocation6], 1 }
 0x1ae   :  { %293 = vsyncpa [#allocation6 + $0x1], 1 }
 0x1af   :  { %294 = vsyncpa [#allocation7], 1 }
 0x1b0   :  { %296 = vsyncpa [#allocation7 + $0x1], 1 }

</bundles_post_ra>
